<compile_context>
chip_gen: v7x
topology: tpu7x:2x2x1
jax: 0.10.0
libtpu: 0.0.40
codegen_flags: <defaults>
</compile_context>

<pallas_src>
import functools
from typing import NamedTuple

import numpy as np
import jax
import jax.numpy as jnp
from jax import lax
from jax.experimental import pallas as pl
from jax.experimental.pallas import tpu as pltpu


class Dims(NamedTuple):
  cin: int
  o1: int
  o2: int
  h1: int
  h2: int
  out: int
  c1_off: int
  c2_off: int
  fc2_off: int
  fc3_off: int
  b_off: int


# --------------------------------- kernel -----------------------------------

def simple_cnn1d_kernel(dims, x1_ref, x2_ref, fc1w_ref, slab_ref, o_ref,
                        xp1_ref, y1_ref, xp2_ref, y2_ref):
  cin, o1, o2 = dims.cin, dims.o1, dims.o2
  h1, h2, out = dims.h1, dims.h2, dims.out
  l1 = x1_ref.shape[0]
  L = l1 + x2_ref.shape[0]                 # full sequence length (32)
  L2, L4 = L // 2, L // 4

  def wblk(off, rows, cols):               # static slab views -> free
    return slab_ref[pl.ds(off, rows), pl.ds(0, cols)]

  def bias(i, cols):
    return slab_ref[pl.ds(dims.b_off + i, 1), pl.ds(0, cols)]

  # ---- zero-padded conv1 input (L+2, Cin); rows 1..L hold [x1 ; x2] --------
  # (torch's transpose(0,1) + cat along the sequence dim, done in VMEM)
  xp1_ref[...] = jnp.zeros_like(xp1_ref)
  xp1_ref[pl.ds(1, l1), :] = x1_ref[...]
  xp1_ref[pl.ds(1 + l1, L - l1), :] = x2_ref[...]

  # ---- conv1 (k=3, stride=1, pad=1) + ReLU: 3 tap matmuls on shifted rows --
  y1 = bias(0, o1)
  for t in range(3):
    y1 = y1 + jnp.dot(xp1_ref[pl.ds(t, L), :],
                      wblk(dims.c1_off + t * cin, cin, o1),
                      preferred_element_type=jnp.float32)
  y1_ref[...] = jnp.maximum(y1, 0.0)                           # (L, O1)

  # ---- maxpool1 (k=2, s=2): strided even/odd reads, one max, one store -----
  xp2_ref[...] = jnp.zeros_like(xp2_ref)
  xp2_ref[pl.ds(1, L2), :] = jnp.maximum(
      y1_ref[pl.ds(0, L2, stride=2), :],
      y1_ref[pl.ds(1, L2, stride=2), :])

  # ---- conv2 (k=3, stride=1, pad=1) + ReLU ---------------------------------
  y2 = bias(1, o2)
  for t in range(3):
    y2 = y2 + jnp.dot(xp2_ref[pl.ds(t, L2), :],
                      wblk(dims.c2_off + t * o1, o1, o2),
                      preferred_element_type=jnp.float32)
  y2_ref[...] = jnp.maximum(y2, 0.0)                           # (L/2, O2)

  # ---- maxpool2 + channel-major flatten + fc1, fused -----------------------
  # torch's flat index (c*Lp + l) is folded into fc1w's (Lp, O2, H1) layout,
  # so the pooled (Lp, O2) block contracts against it in one batched dot.
  p2 = jnp.maximum(y2_ref[pl.ds(0, L4, stride=2), :],
                   y2_ref[pl.ds(1, L4, stride=2), :])          # (Lp, O2)
  hb = lax.dot_general(p2[:, None, :], fc1w_ref[...],
                       dimension_numbers=(((2,), (1,)), ((0,), (0,))),
                       preferred_element_type=jnp.float32)     # (Lp, 1, H1)
  h = jnp.maximum(jnp.sum(hb, axis=0) + bias(2, h1), 0.0)      # (1, H1)

  # ---- fc2 + ReLU -----------------------------------------------------------
  h = jnp.maximum(
      jnp.dot(h, wblk(dims.fc2_off, h1, h2),
              preferred_element_type=jnp.float32) + bias(3, h2), 0.0)

  # Dropout(0.3): identity at inference.
  # ---- fc3 + numerically stable sigmoid -------------------------------------
  z = jnp.dot(h, wblk(dims.fc3_off, h2, out),
              preferred_element_type=jnp.float32) + bias(4, out)
  ez = jnp.exp(-jnp.abs(z))                                    # EUP
  o_ref[...] = jnp.where(z >= 0.0, 1.0, ez) / (1.0 + ez)


# -------------------------------- wrapper ------------------------------------

def _vmem_spec():
  return pl.BlockSpec(memory_space=pltpu.MemorySpace.VMEM)


@functools.partial(jax.jit, static_argnames=("dims",))
def simple_cnn1d_forward(x1, x2, fc1w, slab, dims):
  l1, cin = x1.shape
  L = l1 + x2.shape[0]
  assert L % 4 == 0, "MaxPool1d(2,2) twice requires total length % 4 == 0"
  return pl.pallas_call(
      functools.partial(simple_cnn1d_kernel, dims),
      out_shape=jax.ShapeDtypeStruct((1, dims.out), jnp.float32),
      in_specs=[_vmem_spec()] * 4,
      out_specs=_vmem_spec(),
      scratch_shapes=[
          pltpu.VMEM((L + 2, cin), jnp.float32),            # padded conv1 input
          pltpu.VMEM((L, dims.o1), jnp.float32),            # conv1 activations
          pltpu.VMEM((L // 2 + 2, dims.o1), jnp.float32),   # padded conv2 input
          pltpu.VMEM((L // 2, dims.o2), jnp.float32),       # conv2 activations
      ],
  )(x1.astype(jnp.float32), x2.astype(jnp.float32), fc1w, slab)


# ----------------------- parameters (torch layout) ---------------------------

def init_params(key, in_channels, o1, o2, h1, h2, out_size):
  ks = jax.random.split(key, 10)

  def rnd(k, shape, scale=0.1):
    return scale * jax.random.normal(k, shape, dtype=jnp.float32)

  return {
      "conv1_w": rnd(ks[0], (o1, in_channels, 3)),   # Conv1d: (Cout, Cin, K)
      "conv1_b": rnd(ks[1], (o1,)),
      "conv2_w": rnd(ks[2], (o2, o1, 3)),
      "conv2_b": rnd(ks[3], (o2,)),
      "fc1_w": rnd(ks[4], (h1, o2 * 8)),             # Linear: (out, in)
      "fc1_b": rnd(ks[5], (h1,)),
      "fc2_w": rnd(ks[6], (h2, h1)),
      "fc2_b": rnd(ks[7], (h2,)),
      "fc3_w": rnd(ks[8], (out_size, h2)),
      "fc3_b": rnd(ks[9], (out_size,)),
  }


def pack_params(tp, L):
  """One-time host-side repack: one 2-D slab + the 3-D FC1 weight + static dims."""
  o1, cin, _ = tp["conv1_w"].shape
  o2 = tp["conv2_w"].shape[0]
  h1 = tp["fc1_w"].shape[0]
  h2 = tp["fc2_w"].shape[0]
  out = tp["fc3_w"].shape[0]
  Lp = L // 4
  assert tp["fc1_w"].shape[1] == o2 * Lp

  r8 = lambda n: ((n + 7) // 8) * 8
  c1_off = 0
  c2_off = c1_off + r8(3 * cin)
  fc2_off = c2_off + r8(3 * o1)
  fc3_off = fc2_off + r8(h1)
  b_off = fc3_off + r8(h2)
  nrows, ncols = b_off + 8, max(o1, o2, h1, h2, out)

  slab = np.zeros((nrows, ncols), np.float32)
  # conv weights, tap-major: tap t occupies rows [off + t*Cin, off + (t+1)*Cin).
  slab[c1_off:c1_off + 3 * cin, :o1] = (
      np.transpose(np.asarray(tp["conv1_w"]), (2, 1, 0)).reshape(3 * cin, o1))
  slab[c2_off:c2_off + 3 * o1, :o2] = (
      np.transpose(np.asarray(tp["conv2_w"]), (2, 1, 0)).reshape(3 * o1, o2))
  slab[fc2_off:fc2_off + h1, :h2] = np.asarray(tp["fc2_w"]).T
  slab[fc3_off:fc3_off + h2, :out] = np.asarray(tp["fc3_w"]).T
  slab[b_off + 0, :o1] = np.asarray(tp["conv1_b"])
  slab[b_off + 1, :o2] = np.asarray(tp["conv2_b"])
  slab[b_off + 2, :h1] = np.asarray(tp["fc1_b"])
  slab[b_off + 3, :h2] = np.asarray(tp["fc2_b"])
  slab[b_off + 4, :out] = np.asarray(tp["fc3_b"])

  # torch flat index = c*Lp + l; pooled rows are consumed in (Lp, O2) layout,
  # so regroup FC1's weight to (Lp, O2, H1) once here.
  fc1w = jnp.transpose(jnp.reshape(tp["fc1_w"], (h1, o2, Lp)), (2, 1, 0))

  dims = Dims(cin=cin, o1=o1, o2=o2, h1=h1, h2=h2, out=out,
              c1_off=c1_off, c2_off=c2_off, fc2_off=fc2_off,
              fc3_off=fc3_off, b_off=b_off)
  return jnp.asarray(slab), fc1w, dims


# ------------------------------ JAX reference ---------------------------------

def ref_forward(x1, x2, tp):
  x = jnp.concatenate([x1.T, x2.T], axis=1)[None]            # (1, Cin, L)

  def conv(x, w, b):
    y = lax.conv_general_dilated(
        x, w, window_strides=(1,), padding=((1, 1),),
        dimension_numbers=("NCH", "OIH", "NCH"))
    return y + b.reshape(1, -1, 1)

  def pool(y):
    n, c, l = y.shape
    return y.reshape(n, c, l // 2, 2).max(axis=-1)

  y = pool(jax.nn.relu(conv(x, tp["conv1_w"], tp["conv1_b"])))
  y = pool(jax.nn.relu(conv(y, tp["conv2_w"], tp["conv2_b"])))
  flat = y.reshape(1, -1)
  h = jax.nn.relu(flat @ tp["fc1_w"].T + tp["fc1_b"])
  h = jax.nn.relu(h @ tp["fc2_w"].T + tp["fc2_b"])
  return jax.nn.sigmoid(h @ tp["fc3_w"].T + tp["fc3_b"])


# ---------------------------------- main ---------------------------------------

if __name__ == "__main__":
  key = jax.random.PRNGKey(0)
  k_x1, k_x2, k_p = jax.random.split(key, 3)

  in_channels, o1, o2, h1, h2, out_size = 4, 8, 16, 32, 16, 4
  # L1 + L2 must be 32 so the flattened conv output has o2 * 8 features,
  # matching nn.Linear(out_channels2 * 8, hidden_size1).
  x1 = jax.random.normal(k_x1, (16, in_channels), dtype=jnp.float32)
  x2 = jax.random.normal(k_x2, (16, in_channels), dtype=jnp.float32)

  torch_params = init_params(k_p, in_channels, o1, o2, h1, h2, out_size)
  slab, fc1w, dims = pack_params(torch_params, x1.shape[0] + x2.shape[0])

  out = jax.block_until_ready(simple_cnn1d_forward(x1, x2, fc1w, slab, dims))
  ref = jax.block_until_ready(ref_forward(x1, x2, torch_params))

  assert out.shape == (1, out_size), out.shape
  assert bool(jnp.allclose(out, ref, atol=1e-5, rtol=1e-5)), (out, ref)
  print("KERNEL_OK")
</pallas_src>

<mosaic_0001>
module attributes {stable_mosaic.version = 11 : i64} {
  func.func @simple_cnn1d_kernel(%arg0: memref<16x4xf32, #tpu.memory_space<vmem>>, %arg1: memref<16x4xf32, #tpu.memory_space<vmem>>, %arg2: memref<8x16x32xf32, #tpu.memory_space<vmem>>, %arg3: memref<96x32xf32, #tpu.memory_space<vmem>>, %arg4: memref<1x4xf32, #tpu.memory_space<vmem>>, %arg5: memref<34x4xf32, #tpu.memory_space<vmem>>, %arg6: memref<32x8xf32, #tpu.memory_space<vmem>>, %arg7: memref<18x8xf32, #tpu.memory_space<vmem>>, %arg8: memref<16x16xf32, #tpu.memory_space<vmem>>) attributes {dimension_semantics = [], scalar_prefetch = 0 : i64, scratch_operands = 4 : i64, tpu.core_type = #tpu.core_type<tc>} {
    %cst = arith.constant 0.000000e+00 : f32
    %0 = vector.broadcast %cst : f32 to vector<34x4xf32>
    %c0 = arith.constant 0 : index
    %c0_0 = arith.constant 0 : index
    %1 = vector.load %arg5[%c0, %c0_0] : memref<34x4xf32, #tpu.memory_space<vmem>>, vector<34x4xf32>
    tpu.vector_store %arg5[%c0, %c0_0], %0 {strides = array<i32>} : memref<34x4xf32, #tpu.memory_space<vmem>>, vector<34x4xf32>,
    %c0_1 = arith.constant 0 : index
    %c0_2 = arith.constant 0 : index
    %2 = vector.load %arg0[%c0_1, %c0_2] : memref<16x4xf32, #tpu.memory_space<vmem>>, vector<16x4xf32>
    %c1 = arith.constant 1 : index
    %c0_3 = arith.constant 0 : index
    %3 = vector.load %arg5[%c1, %c0_3] : memref<34x4xf32, #tpu.memory_space<vmem>>, vector<16x4xf32>
    tpu.vector_store %arg5[%c1, %c0_3], %2 {strides = array<i32>} : memref<34x4xf32, #tpu.memory_space<vmem>>, vector<16x4xf32>,
    %c0_4 = arith.constant 0 : index
    %c0_5 = arith.constant 0 : index
    %4 = vector.load %arg1[%c0_4, %c0_5] : memref<16x4xf32, #tpu.memory_space<vmem>>, vector<16x4xf32>
    %c17 = arith.constant 17 : index
    %c0_6 = arith.constant 0 : index
    %5 = vector.load %arg5[%c17, %c0_6] : memref<34x4xf32, #tpu.memory_space<vmem>>, vector<16x4xf32>
    tpu.vector_store %arg5[%c17, %c0_6], %4 {strides = array<i32>} : memref<34x4xf32, #tpu.memory_space<vmem>>, vector<16x4xf32>,
    %c88 = arith.constant 88 : index
    %c0_7 = arith.constant 0 : index
    %6 = vector.load %arg3[%c88, %c0_7] : memref<96x32xf32, #tpu.memory_space<vmem>>, vector<1x8xf32>
    %c0_8 = arith.constant 0 : index
    %c0_9 = arith.constant 0 : index
    %7 = vector.load %arg5[%c0_8, %c0_9] : memref<34x4xf32, #tpu.memory_space<vmem>>, vector<32x4xf32>
    %c0_10 = arith.constant 0 : index
    %c0_11 = arith.constant 0 : index
    %8 = vector.load %arg3[%c0_10, %c0_11] : memref<96x32xf32, #tpu.memory_space<vmem>>, vector<4x8xf32>
    %cst_12 = arith.constant dense<0.000000e+00> : vector<32x8xf32>
    %9 = tpu.matmul %7, %8, %cst_12 {dimension_numbers = #tpu.dot_dimension_numbers<[1], [0], [0], [1], [0, 0, 1, 1], [], []>} : vector<32x4xf32>, vector<4x8xf32>, vector<32x8xf32> -> vector<32x8xf32>
    %10 = vector.broadcast %6 : vector<1x8xf32> to vector<32x8xf32>
    %11 = arith.addf %10, %9 : vector<32x8xf32>
    %c1_13 = arith.constant 1 : index
    %c0_14 = arith.constant 0 : index
    %12 = vector.load %arg5[%c1_13, %c0_14] : memref<34x4xf32, #tpu.memory_space<vmem>>, vector<32x4xf32>
    %c4 = arith.constant 4 : index
    %c0_15 = arith.constant 0 : index
    %13 = vector.load %arg3[%c4, %c0_15] : memref<96x32xf32, #tpu.memory_space<vmem>>, vector<4x8xf32>
    %cst_16 = arith.constant dense<0.000000e+00> : vector<32x8xf32>
    %14 = tpu.matmul %12, %13, %cst_16 {dimension_numbers = #tpu.dot_dimension_numbers<[1], [0], [0], [1], [0, 0, 1, 1], [], []>} : vector<32x4xf32>, vector<4x8xf32>, vector<32x8xf32> -> vector<32x8xf32>
    %15 = arith.addf %11, %14 : vector<32x8xf32>
    %c2 = arith.constant 2 : index
    %c0_17 = arith.constant 0 : index
    %16 = vector.load %arg5[%c2, %c0_17] : memref<34x4xf32, #tpu.memory_space<vmem>>, vector<32x4xf32>
    %c8 = arith.constant 8 : index
    %c0_18 = arith.constant 0 : index
    %17 = vector.load %arg3[%c8, %c0_18] : memref<96x32xf32, #tpu.memory_space<vmem>>, vector<4x8xf32>
    %cst_19 = arith.constant dense<0.000000e+00> : vector<32x8xf32>
    %18 = tpu.matmul %16, %17, %cst_19 {dimension_numbers = #tpu.dot_dimension_numbers<[1], [0], [0], [1], [0, 0, 1, 1], [], []>} : vector<32x4xf32>, vector<4x8xf32>, vector<32x8xf32> -> vector<32x8xf32>
    %19 = arith.addf %15, %18 : vector<32x8xf32>
    %cst_20 = arith.constant 0.000000e+00 : f32
    %20 = vector.broadcast %cst_20 : f32 to vector<32x8xf32>
    %21 = arith.maximumf %19, %20 : vector<32x8xf32>
    %c0_21 = arith.constant 0 : index
    %c0_22 = arith.constant 0 : index
    %22 = vector.load %arg6[%c0_21, %c0_22] : memref<32x8xf32, #tpu.memory_space<vmem>>, vector<32x8xf32>
    tpu.vector_store %arg6[%c0_21, %c0_22], %21 {strides = array<i32>} : memref<32x8xf32, #tpu.memory_space<vmem>>, vector<32x8xf32>,
    %cst_23 = arith.constant 0.000000e+00 : f32
    %23 = vector.broadcast %cst_23 : f32 to vector<18x8xf32>
    %c0_24 = arith.constant 0 : index
    %c0_25 = arith.constant 0 : index
    %24 = vector.load %arg7[%c0_24, %c0_25] : memref<18x8xf32, #tpu.memory_space<vmem>>, vector<18x8xf32>
    tpu.vector_store %arg7[%c0_24, %c0_25], %23 {strides = array<i32>} : memref<18x8xf32, #tpu.memory_space<vmem>>, vector<18x8xf32>,
    %c0_26 = arith.constant 0 : index
    %c0_27 = arith.constant 0 : index
    %25 = tpu.strided_load %arg6[%c0_26, %c0_27] {strides = array<i32: 2, 1>} : memref<32x8xf32, #tpu.memory_space<vmem>>, vector<16x8xf32>
    %c1_28 = arith.constant 1 : index
    %c0_29 = arith.constant 0 : index
    %26 = tpu.strided_load %arg6[%c1_28, %c0_29] {strides = array<i32: 2, 1>} : memref<32x8xf32, #tpu.memory_space<vmem>>, vector<16x8xf32>
    %27 = arith.maximumf %25, %26 : vector<16x8xf32>
    %c1_30 = arith.constant 1 : index
    %c0_31 = arith.constant 0 : index
    %28 = vector.load %arg7[%c1_30, %c0_31] : memref<18x8xf32, #tpu.memory_space<vmem>>, vector<16x8xf32>
    tpu.vector_store %arg7[%c1_30, %c0_31], %27 {strides = array<i32>} : memref<18x8xf32, #tpu.memory_space<vmem>>, vector<16x8xf32>,
    %c89 = arith.constant 89 : index
    %c0_32 = arith.constant 0 : index
    %29 = vector.load %arg3[%c89, %c0_32] : memref<96x32xf32, #tpu.memory_space<vmem>>, vector<1x16xf32>
    %c0_33 = arith.constant 0 : index
    %c0_34 = arith.constant 0 : index
    %30 = vector.load %arg7[%c0_33, %c0_34] : memref<18x8xf32, #tpu.memory_space<vmem>>, vector<16x8xf32>
    %c16 = arith.constant 16 : index
    %c0_35 = arith.constant 0 : index
    %31 = vector.load %arg3[%c16, %c0_35] : memref<96x32xf32, #tpu.memory_space<vmem>>, vector<8x16xf32>
    %cst_36 = arith.constant dense<0.000000e+00> : vector<16x16xf32>
    %32 = tpu.matmul %30, %31, %cst_36 {dimension_numbers = #tpu.dot_dimension_numbers<[1], [0], [0], [1], [0, 0, 1, 1], [], []>} : vector<16x8xf32>, vector<8x16xf32>, vector<16x16xf32> -> vector<16x16xf32>
    %33 = vector.broadcast %29 : vector<1x16xf32> to vector<16x16xf32>
    %34 = arith.addf %33, %32 : vector<16x16xf32>
    %c1_37 = arith.constant 1 : index
    %c0_38 = arith.constant 0 : index
    %35 = vector.load %arg7[%c1_37, %c0_38] : memref<18x8xf32, #tpu.memory_space<vmem>>, vector<16x8xf32>
    %c24 = arith.constant 24 : index
    %c0_39 = arith.constant 0 : index
    %36 = vector.load %arg3[%c24, %c0_39] : memref<96x32xf32, #tpu.memory_space<vmem>>, vector<8x16xf32>
    %cst_40 = arith.constant dense<0.000000e+00> : vector<16x16xf32>
    %37 = tpu.matmul %35, %36, %cst_40 {dimension_numbers = #tpu.dot_dimension_numbers<[1], [0], [0], [1], [0, 0, 1, 1], [], []>} : vector<16x8xf32>, vector<8x16xf32>, vector<16x16xf32> -> vector<16x16xf32>
    %38 = arith.addf %34, %37 : vector<16x16xf32>
    %c2_41 = arith.constant 2 : index
    %c0_42 = arith.constant 0 : index
    %39 = vector.load %arg7[%c2_41, %c0_42] : memref<18x8xf32, #tpu.memory_space<vmem>>, vector<16x8xf32>
    %c32 = arith.constant 32 : index
    %c0_43 = arith.constant 0 : index
    %40 = vector.load %arg3[%c32, %c0_43] : memref<96x32xf32, #tpu.memory_space<vmem>>, vector<8x16xf32>
    %cst_44 = arith.constant dense<0.000000e+00> : vector<16x16xf32>
    %41 = tpu.matmul %39, %40, %cst_44 {dimension_numbers = #tpu.dot_dimension_numbers<[1], [0], [0], [1], [0, 0, 1, 1], [], []>} : vector<16x8xf32>, vector<8x16xf32>, vector<16x16xf32> -> vector<16x16xf32>
    %42 = arith.addf %38, %41 : vector<16x16xf32>
    %cst_45 = arith.constant 0.000000e+00 : f32
    %43 = vector.broadcast %cst_45 : f32 to vector<16x16xf32>
    %44 = arith.maximumf %42, %43 : vector<16x16xf32>
    %c0_46 = arith.constant 0 : index
    %c0_47 = arith.constant 0 : index
    %45 = vector.load %arg8[%c0_46, %c0_47] : memref<16x16xf32, #tpu.memory_space<vmem>>, vector<16x16xf32>
    tpu.vector_store %arg8[%c0_46, %c0_47], %44 {strides = array<i32>} : memref<16x16xf32, #tpu.memory_space<vmem>>, vector<16x16xf32>,
    %c0_48 = arith.constant 0 : index
    %c0_49 = arith.constant 0 : index
    %46 = tpu.strided_load %arg8[%c0_48, %c0_49] {strides = array<i32: 2, 1>} : memref<16x16xf32, #tpu.memory_space<vmem>>, vector<8x16xf32>
    %c1_50 = arith.constant 1 : index
    %c0_51 = arith.constant 0 : index
    %47 = tpu.strided_load %arg8[%c1_50, %c0_51] {strides = array<i32: 2, 1>} : memref<16x16xf32, #tpu.memory_space<vmem>>, vector<8x16xf32>
    %48 = arith.maximumf %46, %47 : vector<8x16xf32>
    %49 = vector.shape_cast %48 : vector<8x16xf32> to vector<8x1x16xf32>
    %c0_52 = arith.constant 0 : index
    %c0_53 = arith.constant 0 : index
    %c0_54 = arith.constant 0 : index
    %50 = vector.load %arg2[%c0_52, %c0_53, %c0_54] : memref<8x16x32xf32, #tpu.memory_space<vmem>>, vector<8x16x32xf32>
    %cst_55 = arith.constant dense<0.000000e+00> : vector<8x1x32xf32>
    %51 = tpu.matmul %49, %50, %cst_55 {dimension_numbers = #tpu.dot_dimension_numbers<[2], [1], [1], [2], [0, 0, 0, 1, 1, 2], [0], [0]>} : vector<8x1x16xf32>, vector<8x16x32xf32>, vector<8x1x32xf32> -> vector<8x1x32xf32>
    %cst_56 = arith.constant dense<0.000000e+00> : vector<1x32xf32>
    %52 = vector.multi_reduction <add>, %51, %cst_56 [0] : vector<8x1x32xf32> to vector<1x32xf32>
    %c90 = arith.constant 90 : index
    %c0_57 = arith.constant 0 : index
    %53 = vector.load %arg3[%c90, %c0_57] : memref<96x32xf32, #tpu.memory_space<vmem>>, vector<1x32xf32>
    %54 = arith.addf %52, %53 : vector<1x32xf32>
    %cst_58 = arith.constant 0.000000e+00 : f32
    %55 = vector.broadcast %cst_58 : f32 to vector<1x32xf32>
    %56 = arith.maximumf %54, %55 : vector<1x32xf32>
    %c40 = arith.constant 40 : index
    %c0_59 = arith.constant 0 : index
    %57 = vector.load %arg3[%c40, %c0_59] : memref<96x32xf32, #tpu.memory_space<vmem>>, vector<32x16xf32>
    %cst_60 = arith.constant dense<0.000000e+00> : vector<1x16xf32>
    %58 = tpu.matmul %56, %57, %cst_60 {dimension_numbers = #tpu.dot_dimension_numbers<[1], [0], [0], [1], [0, 0, 1, 1], [], []>} : vector<1x32xf32>, vector<32x16xf32>, vector<1x16xf32> -> vector<1x16xf32>
    %c91 = arith.constant 91 : index
    %c0_61 = arith.constant 0 : index
    %59 = vector.load %arg3[%c91, %c0_61] : memref<96x32xf32, #tpu.memory_space<vmem>>, vector<1x16xf32>
    %60 = arith.addf %58, %59 : vector<1x16xf32>
    %cst_62 = arith.constant 0.000000e+00 : f32
    %61 = vector.broadcast %cst_62 : f32 to vector<1x16xf32>
    %62 = arith.maximumf %60, %61 : vector<1x16xf32>
    %c72 = arith.constant 72 : index
    %c0_63 = arith.constant 0 : index
    %63 = vector.load %arg3[%c72, %c0_63] : memref<96x32xf32, #tpu.memory_space<vmem>>, vector<16x4xf32>
    %cst_64 = arith.constant dense<0.000000e+00> : vector<1x4xf32>
    %64 = tpu.matmul %62, %63, %cst_64 {dimension_numbers = #tpu.dot_dimension_numbers<[1], [0], [0], [1], [0, 0, 1, 1], [], []>} : vector<1x16xf32>, vector<16x4xf32>, vector<1x4xf32> -> vector<1x4xf32>
    %c92 = arith.constant 92 : index
    %c0_65 = arith.constant 0 : index
    %65 = vector.load %arg3[%c92, %c0_65] : memref<96x32xf32, #tpu.memory_space<vmem>>, vector<1x4xf32>
    %66 = arith.addf %64, %65 : vector<1x4xf32>
    %67 = math.absf %66 : vector<1x4xf32>
    %cst_66 = arith.constant 0.000000e+00 : f32
    %68 = vector.broadcast %cst_66 : f32 to vector<1x4xf32>
    %69 = arith.subf %68, %67 : vector<1x4xf32>
    %70 = math.exp %69 : vector<1x4xf32>
    %cst_67 = arith.constant 0.000000e+00 : f32
    %71 = vector.broadcast %cst_67 : f32 to vector<1x4xf32>
    %72 = arith.cmpf oge, %66, %71 : vector<1x4xf32>
    %cst_68 = arith.constant 1.000000e+00 : f32
    %73 = vector.broadcast %cst_68 : f32 to vector<1x4xf32>
    %74 = arith.select %72, %73, %70 : vector<1x4xi1>, vector<1x4xf32>
    %cst_69 = arith.constant 1.000000e+00 : f32
    %75 = vector.broadcast %cst_69 : f32 to vector<1x4xf32>
    %76 = arith.addf %75, %70 : vector<1x4xf32>
    %77 = arith.divf %74, %76 : vector<1x4xf32>
    %c0_70 = arith.constant 0 : index
    %c0_71 = arith.constant 0 : index
    %78 = vector.load %arg4[%c0_70, %c0_71] : memref<1x4xf32, #tpu.memory_space<vmem>>, vector<1x4xf32>
    tpu.vector_store %arg4[%c0_70, %c0_71], %77 {strides = array<i32>} : memref<1x4xf32, #tpu.memory_space<vmem>>, vector<1x4xf32>,
    return
  }
}

</mosaic_0001>

<bundles_post_ra>
// kernel: simple_cnn1d_forward.1
= control target key start
LH: loop header
LB: loop body
LE: loop exit
PB: predicated region body
PF: predicated region fallthrough
CT: control target
= control target key end

     0   :  { %vm51_vm0 = vcmask 1043456   ;;  %vm18_vm1 = vcmask 31744   ;;  %v1790_v2 = vmov 0.0   ;;  %vm23_vm2 = vcmask 25600   ;;  %s2041_s0 = inlined_call_operand.vmem [shape: f32[16,4], index: 0, kind: input, shape index: {}]   ;;  %s2042_s1 = inlined_call_operand.vmem [shape: f32[16,4], index: 1, kind: input, shape index: {}]   ;;  %s2043_s2 = inlined_call_operand.vmem [shape: f32[8,16,32], index: 2, kind: input, shape index: {}]   ;;  %s2044_s3 = inlined_call_operand.vmem [shape: f32[96,32], index: 3, kind: input, shape index: {}]   ;;  %s2045_s4 = inlined_call_operand.hbm [shape: f32[1,4], index: 4, kind: output, shape index: {}]  }
   0x1   :  { %v38_v0 = vld [vmem:[%s2044_s3] sm:$0xf]  ;;  %19 = vst.msk [vmem:[#allocation2] sm:$0xff] %vm18_vm1, %v1790_v2  ;;  %20 = vst.msk [vmem:[#allocation2 + $0x8] sm:$0xff] %vm18_vm1, %v1790_v2  ;;  %v152_v3 = vld [vmem:[%s2044_s3 + $0x4] sm:$0xf] }
   0x2   :  { %v25_v1 = vld [vmem:[%s2041_s0] sm:$0xff]  ;;  %1593 = vmatprep.subr.msk.mxu0 %vm51_vm0, %v38_v0  ;;  %21 = vst.msk [vmem:[#allocation2 + $0x10] sm:$0xff] %vm18_vm1, %v1790_v2  ;;  %22 = vst.msk [vmem:[#allocation2 + $0x18] sm:$0xff] %vm18_vm1, %v1790_v2  ;;  %v26_v4 = vld [vmem:[%s2041_s0 + $0x8] sm:$0xff] }
   0x3   :  { %v29_v5 = vld [vmem:[%s2042_s1] sm:$0xff]  ;;  %1594 = vmatpush3.msk.msra.mxu0 %vm51_vm0, %v38_v0  ;;  %27 = vst.msk [vmem:[#allocation2 + $0x1] sm:$0xff] %vm18_vm1, %v25_v1  ;;  %28 = vst.msk [vmem:[#allocation2 + $0x9] sm:$0xff] %vm18_vm1, %v26_v4  ;;  %v30_v6 = vld [vmem:[%s2042_s1 + $0x8] sm:$0xff] }
   0x4   :  { %31 = vst.msk [vmem:[#allocation2 + $0x11] sm:$0xff] %vm18_vm1, %v29_v5  ;;  %1601 = vmatprep.subr.msk.mxu0 %vm51_vm0, %v152_v3 }
   0x5   :  { %24 = vst.msk [vmem:[#allocation2 + $0x20] sm:$0x3] %vm23_vm2, %v1790_v2 }
   0x6   :  { %32 = vst.msk [vmem:[#allocation2 + $0x19] sm:$0xff] %vm18_vm1, %v30_v6 }
   0x7   :  { %9 = vsyncpa [#allocation7], 0  ;;  %v261_v10 = vld [vmem:[%s2044_s3 + $0x8] sm:$0xf]  ;;  %vm370_vm3 = vcmask 64512   ;;  %vm377_vm4 = vcmask 58368   ;;  %v667_v0 = vlaneseq }
   0x8   :  { %375 = vst.msk [vmem:[#allocation4] sm:$0xff] %vm370_vm3, %v1790_v2  ;;  %376 = vst.msk [vmem:[#allocation4 + $0x8] sm:$0xff] %vm370_vm3, %v1790_v2  ;;  %v393_v20 = vld [vmem:[%s2044_s3 + $0x10] sm:$0xff]  ;;  %v483_v21 = vld [vmem:[%s2044_s3 + $0x18] sm:$0xff]  ;;  %v1791_v50 = vmov 0.0|0.0   ;;  %vm1792_vm5 = vmmov 0  }
   0x9   :  { %378 = vst.msk [vmem:[#allocation4 + $0x10] sm:$0x3] %vm377_vm4, %v1790_v2  ;;  %1617 = vmatprep.subr.mxu1 %v393_v20  ;;  %v1509_v22 = vld [vmem:[%s2044_s3 + $0x58] ss:$0 sm:$0xff]  ;;  %v569_v43 = vld [vmem:[%s2044_s3 + $0x20] sm:$0xff]  ;;  %v713_v49 = vld [vmem:[%s2043_s2 + $0x8] sm:$0xff] }
   0xa   :  { %v34_v7 = vld [vmem:[#allocation2] sm:$0xff]  ;;  %v35_v8 = vld [vmem:[#allocation2 + $0x8] sm:$0xff]  ;;  %1618 = vmatpush3.msra.mxu1 %v393_v20  ;;  %v718_v52 = vld [vmem:[%s2043_s2 + $0x30] sm:$0xff]  ;;  %vm655_vm6 = vcmask 130048   ;;  %v1793_v62 = vmov 1966171168  }
   0xb   :  { %v36_v9 = vld [vmem:[#allocation2 + $0x10] sm:$0xff]  ;;  %1595 = vmatprep.mubr.msk.f32.mxu0 %vm18_vm1, %v34_v7  ;;  %v148_v12 = vld [vmem:[#allocation2 + $0x1] sm:$0xff]  ;;  %1622 = vmatprep.subr.mxu1 %v483_v21  ;;  %v719_v53 = vld [vmem:[%s2043_s2 + $0x38] sm:$0xff]  ;;  %v665_v63 = vunpack.c.l.s4 %v1793_v62  ;;  %vm1304_vm7 = vcmask 253952   ;;  %vm1328_vm8 = vcmask 261120   ;;  %s1794_s30 = smov [#allocation6]  }
   0xc   :  { %1596 = vmatmul.mubr.msk.f32.vlgmr.msra.gmra.mrb[0].mxu0 %vm18_vm1, %v35_v8  ;;  %v149_v13 = vld [vmem:[#allocation2 + $0x9] sm:$0xff]  ;;  %v150_v14 = vld [vmem:[#allocation2 + $0x11] sm:$0xff]  ;;  %v712_v48 = vld [vmem:[%s2043_s2] sm:$0xff]  ;;  %v1716_v54 = vpack.c.bf16 %v719_v53, %v718_v52  ;;  %s1496_s5 = sshll.u32 %s1794_s30, 4  ;;  %vm1488_vm10 = vcmask 24576   ;;  %s1497_s5 = int_to_ptr.vmem [resolvable:$true] %s1496_s5 }
   0xd   :  { %1602 = vmatpush3.msk.msra.mxu0 %vm51_vm0, %v152_v3  ;;  %1598 = vmatprep.mubr.msk.f32.mxu0 %vm18_vm1, %v36_v9  ;;  %v37_v11 = vld [vmem:[#allocation2 + $0x18] sm:$0xff]  ;;  %v257_v16 = vld [vmem:[#allocation2 + $0x2] sm:$0xff]  ;;  %v258_v17 = vld [vmem:[#allocation2 + $0xa] sm:$0xff]  ;;  %v1707_v51 = vpack.c.bf16 %v713_v49, %v712_v48  ;;  %v666_v1 = vunpack.c.0.s8 %v665_v63  ;;  %v668_v3 = vshrl.u32 %v667_v0, 7  ;;  %s1770_s6 = scalar_lea.vmem %s1497_s5, 32  ;;  %p1771_p1 = scmp.lt.s32.totalorder %s1497_s5, %s1497_s5 }
   0xe   :  { %1609 = vmatprep.subr.msk.mxu0 %vm51_vm0, %v261_v10  ;;  %v151_v15 = vld [vmem:[#allocation2 + $0x19] sm:$0xff]  ;;  %v714_v8 = vld [vmem:[%s2043_s2 + $0x10] sm:$0xff] }
   0xf   :  { %v259_v18 = vld [vmem:[#allocation2 + $0x12] sm:$0xff]  ;;  %v260_v19 = vld [vmem:[#allocation2 + $0x1a] sm:$0xff]  ;;  %v669_v4 = vsub.s32 %v666_v1, %v668_v3 }
  0x10   :  { %1599 = vmatmul.mubr.msk.f32.gmra.mrb[2].mxu0 %vm18_vm1, %v37_v11  ;;  %v1522_v55 = vld [vmem:[%s2044_s3 + $0x59] ss:$0 sm:$0xff] }
  0x11   :  { %1603 = vmatprep.mubr.msk.f32.mxu0 %vm18_vm1, %v148_v12  ;;  %v715_v9 = vld [vmem:[%s2043_s2 + $0x18] sm:$0xff] }
  0x12   :  { %v1710_v12 = vpack.c.bf16 %v715_v9, %v714_v8 }
  0x14   :  { %1604 = vmatmul.mubr.msk.f32.vlgmr.msra.gmra.mrb[0].mxu0 %vm18_vm1, %v149_v13  ;;  %v716_v13 = vld [vmem:[%s2043_s2 + $0x20] sm:$0xff] }
  0x15   :  { %1610 = vmatpush3.msk.msra.mxu0 %vm51_vm0, %v261_v10  ;;  %1606 = vmatprep.mubr.msk.f32.mxu0 %vm18_vm1, %v150_v14 }
  0x16   :  { %1715 = vmatprep.subr.bf16.mxu0 %v1791_v50 }
  0x18   :  { %1607 = vmatmul.mubr.msk.f32.gmra.mrb[2].mxu0 %vm18_vm1, %v151_v15 }
  0x19   :  { %1611 = vmatprep.mubr.msk.f32.mxu0 %vm18_vm1, %v257_v16  ;;  %v717_v16 = vld [vmem:[%s2043_s2 + $0x28] sm:$0xff] }
  0x1c   :  { %1612 = vmatmul.mubr.msk.f32.vlgmr.msra.gmra.mrb[0].mxu0 %vm18_vm1, %v258_v17  ;;  %v722_v17 = vld [vmem:[%s2043_s2 + $0x50] sm:$0xff] }
  0x1d   :  { %1614 = vmatprep.mubr.msk.f32.mxu0 %vm18_vm1, %v259_v18  ;;  %1717 = vmatpush3.bf16.msra.mxu0 %v1716_v54  ;;  %v723_v18 = vld [vmem:[%s2043_s2 + $0x58] sm:$0xff] }
  0x1e   :  { %1721 = vmatprep.subr.bf16.mxu0 %v1791_v50 }
  0x20   :  { %1615 = vmatmul.mubr.msk.f32.gmra.mrb[2].mxu0 %vm18_vm1, %v260_v19 }
  0x21   :  { %1657 = vmatprep.mubr.msk.f32.mxu0 %vm1792_vm5, %v1790_v2 }
  0xef   :  { %v1613_v23 = vpop.f32.mrb[0].mxu0 }
  0xf0   :  { %v1739_v24 = vadd.f32 %v1613_v23, %v1509_v22  ;;  %v343_v25 = vpop.f32.mrb[1].mxu0  ;;  %v720_v23 = vld [vmem:[%s2043_s2 + $0x40] sm:$0xff] }
  0xf1   :  { %v1740_v26 = vadd.f32 %v1509_v22, %v343_v25  ;;  %v721_v25 = vld [vmem:[%s2043_s2 + $0x48] sm:$0xff] }
  0xf2   :  { %v367_v27 = vmax.f32 %v1739_v24, 0.0 }
  0xf3   :  { %v366_v28 = vmax.f32 %v1740_v26, 0.0  ;;  %v1616_v29 = vpop.f32.mrb[2].mxu0 }
  0xf4   :  { %372 = vst.msk [vmem:[#allocation3 + $0x8] sm:$0xff] %vm370_vm3, %v367_v27  ;;  %v1741_v30 = vadd.f32 %v1616_v29, %v1509_v22  ;;  %v353_v31 = vpop.f32.mrb[3].mxu0  ;;  %v726_v27 = vld [vmem:[%s2043_s2 + $0x70] sm:$0xff]  ;;  %v1719_v29 = vpack.c.bf16 %v721_v25, %v720_v23  ;;  %v1405_v23 = vld [vmem:[%s2044_s3 + $0x5c] sm:$0x1] }
  0xf5   :  { %371 = vst.msk [vmem:[#allocation3] sm:$0xff] %vm370_vm3, %v366_v28  ;;  %v1742_v32 = vadd.f32 %v1509_v22, %v353_v31  ;;  %v1722_v22 = vpack.c.bf16 %v723_v18, %v722_v17  ;;  %v727_v28 = vld [vmem:[%s2043_s2 + $0x78] sm:$0xff] }
  0xf6   :  { %v369_v33 = vmax.f32 %v1741_v30, 0.0  ;;  %v1728_v30 = vpack.c.bf16 %v727_v28, %v726_v27  ;;  %v1327_v18 = vld [vmem:[%s2044_s3 + $0x5b] sm:$0x1] }
  0xf7   :  { %v368_v34 = vmax.f32 %v1742_v32, 0.0 }
  0xf8   :  { %374 = vst.msk [vmem:[#allocation3 + $0x18] sm:$0xff] %vm370_vm3, %v369_v33  ;;  %v724_v33 = vld [vmem:[%s2043_s2 + $0x60] sm:$0xff] }
  0xf9   :  { %373 = vst.msk [vmem:[#allocation3 + $0x10] sm:$0xff] %vm370_vm3, %v368_v34  ;;  %v725_v34 = vld [vmem:[%s2043_s2 + $0x68] sm:$0xff] }
  0xfc   :  { %v379_v35 = vld [vmem:[#allocation3] ss:$2 sm:$0xff]  ;;  %v383_v36 = vld [vmem:[#allocation3 + $0x1] ss:$2 sm:$0xff] }
  0xfd   :  { %v386_v37 = vmax.f32 %v379_v35, %v383_v36  ;;  %v1725_v35 = vpack.c.bf16 %v725_v34, %v724_v33 }
  0xff   :  { %388 = vst.msk [vmem:[#allocation4 + $0x1] sm:$0xff] %vm370_vm3, %v386_v37 }
 0x100   :  { %v381_v38 = vld [vmem:[#allocation3 + $0x10] ss:$2 sm:$0xff]  ;;  %v385_v39 = vld [vmem:[#allocation3 + $0x11] ss:$2 sm:$0xff] }
 0x101   :  { %v387_v40 = vmax.f32 %v381_v38, %v385_v39  ;;  %v1323_v39 = vld [vmem:[%s2044_s3 + $0x28] sm:$0xff] }
 0x103   :  { %389 = vst.msk [vmem:[#allocation4 + $0x9] sm:$0xff] %vm370_vm3, %v387_v40  ;;  %v1324_v40 = vld [vmem:[%s2044_s3 + $0x30] sm:$0xff] }
 0x106   :  { %v391_v41 = vld [vmem:[#allocation4] sm:$0xff] }
 0x107   :  { %1619 = vmatprep.mubr.msk.f32.mxu1 %vm370_vm3, %v391_v41  ;;  %v481_v44 = vld [vmem:[#allocation4 + $0x1] sm:$0xff]  ;;  %v1731_v41 = vpack.c.bf16 %v1324_v40, %v1323_v39 }
 0x10a   :  { %v392_v42 = vld [vmem:[#allocation4 + $0x8] sm:$0xff] }
 0x10b   :  { %1620 = vmatmul.mubr.msk.f32.vlgmr.msra.gmra.mrb[0].mxu1 %vm370_vm3, %v392_v42  ;;  %v482_v45 = vld [vmem:[#allocation4 + $0x9] sm:$0xff] }
 0x10c   :  { %1623 = vmatpush3.msra.mxu1 %v483_v21  ;;  %1624 = vmatprep.mubr.msk.f32.mxu1 %vm370_vm3, %v481_v44  ;;  %v567_v46 = vld [vmem:[#allocation4 + $0x2] sm:$0xff]  ;;  %v568_v47 = vld [vmem:[#allocation4 + $0xa] sm:$0xff]  ;;  %v1713_v21 = vpack.c.bf16 %v717_v16, %v716_v13 }
 0x10d   :  { %1627 = vmatprep.subr.mxu1 %v569_v43  ;;  %v1325_v42 = vld [vmem:[%s2044_s3 + $0x38] sm:$0xff]  ;;  %v1404_v16 = vld [vmem:[%s2044_s3 + $0x50] sm:$0xff] }
 0x113   :  { %1625 = vmatmul.mubr.msk.f32.vlgmr.msra.gmra.mrb[0].mxu1 %vm370_vm3, %v482_v45 }
 0x114   :  { %1628 = vmatpush3.msra.mxu1 %v569_v43  ;;  %1629 = vmatprep.mubr.msk.f32.mxu1 %vm370_vm3, %v567_v46 }
 0x115   :  { %1706 = vmatprep.subr.bf16.mxu1 %v1791_v50 }
 0x11b   :  { %1630 = vmatmul.mubr.msk.f32.vlgmr.msra.gmra.mrb[0].mxu1 %vm370_vm3, %v568_v47 }
 0x11c   :  { %1636 = vmatprep.mubr.msk.f32.mxu1 %vm1792_vm5, %v1790_v2  ;;  %1708 = vmatpush3.bf16.msra.mxu1 %v1707_v51 }
 0x11d   :  { %1709 = vmatprep.subr.bf16.mxu1 %v1791_v50 }
 0x1ee   :  { %v1631_v56 = vpop.f32.mrb[0].mxu1 }
 0x1ef   :  { %v1743_v57 = vadd.f32 %v1631_v56, %v1522_v55  ;;  %v642_v58 = vpop.f32.mrb[1].mxu1 }
 0x1f0   :  { %v1744_v59 = vadd.f32 %v1522_v55, %v642_v58 }
 0x1f1   :  { %v654_v60 = vmax.f32 %v1743_v57, 0.0 }
 0x1f2   :  { %v653_v61 = vmax.f32 %v1744_v59, 0.0 }
 0x1f3   :  { %657 = vst.msk [vmem:[#allocation5 + $0x8] sm:$0xff] %vm655_vm6, %v654_v60 }
 0x1f4   :  { %656 = vst.msk [vmem:[#allocation5] sm:$0xff] %vm655_vm6, %v653_v61 }
 0x1fb   :  { %v658_v5 = vld [vmem:[#allocation5] ss:$2 sm:$0xff]  ;;  %v660_v6 = vld [vmem:[#allocation5 + $0x1] ss:$2 sm:$0xff] }
 0x1fc   :  { %v661_v7 = vmax.f32 %v658_v5, %v660_v6 }
 0x1fe   :  { %v670_v10 = vrot.slane %v661_v7, %v669_v4  ;;  %v663_v11 = vcombine.high %v661_v7, %v661_v7 }
 0x200   :  { %v686_v14 = vrot.slane %v670_v10, %v669_v4  ;;  %v678_v15 = vcombine.high %v670_v10, %v670_v10  ;;  %v677_v19 = vrot.slane %v663_v11, %v669_v4  ;;  %v1320_v11 = vld [vmem:[%s2044_s3 + $0x5a] sm:$0x1] }
 0x202   :  { %1637 = vmatmul.mubr.msk.f32.vlgmr.msra.gmra.mrb[2].mxu1 %vm655_vm6, %v686_v14  ;;  %v700_v20 = vrot.slane %v678_v15, %v669_v4  ;;  %v679_v26 = vcombine.high %v677_v19, %v677_v19  ;;  %v708_v31 = vcombine.high %v686_v14, %v686_v14  ;;  %v693_v36 = vrot.slane %v677_v19, %v669_v4  ;;  %v1403_v15 = vld [vmem:[%s2044_s3 + $0x48] sm:$0xff] }
 0x203   :  { %1711 = vmatpush3.bf16.msra.mxu1 %v1710_v12  ;;  %1643 = vmatprep.mubr.msk.f32.mxu1 %vm1792_vm5, %v1790_v2  ;;  %v1737_v17 = vpack.c.bf16 %v1404_v16, %v1403_v15 }
 0x204   :  { %1712 = vmatprep.subr.bf16.mxu1 %v1791_v50  ;;  %v710_v24 = vcombine.high %v700_v20, %v700_v20  ;;  %v707_v32 = vrot.slane %v679_v26, %v669_v4  ;;  %v709_v38 = vcombine.high %v693_v36, %v693_v36 }
 0x206   :  { %1644 = vmatmul.mubr.msk.f32.vlgmr.msra.gmra.mrb[4].mxu1 %vm655_vm6, %v700_v20  ;;  %1658 = vmatmul.mubr.msk.f32.vlgmr.msra.gmra.mrb[4].mxu0 %vm655_vm6, %v710_v24  ;;  %v711_v37 = vcombine.high %v707_v32, %v707_v32 }
 0x207   :  { %1714 = vmatpush3.bf16.msra.mxu1 %v1713_v21  ;;  %1723 = vmatpush3.bf16.msra.mxu0 %v1722_v22 }
 0x208   :  { %1650 = vmatprep.mubr.msk.f32.mxu1 %vm1792_vm5, %v1790_v2  ;;  %1718 = vmatprep.subr.bf16.mxu1 %v1791_v50 }
 0x209   :  { %1671 = vmatprep.mubr.msk.f32.mxu0 %vm1792_vm5, %v1790_v2  ;;  %1727 = vmatprep.subr.bf16.mxu0 %v1791_v50 }
 0x20a   :  { %1651 = vmatmul.mubr.msk.f32.vlgmr.msra.gmra.mrb[6].mxu1 %vm655_vm6, %v708_v31  ;;  %1672 = vmatmul.mubr.msk.f32.vlgmr.msra.gmra.mrb[6].mxu0 %vm655_vm6, %v707_v32 }
 0x20b   :  { %1720 = vmatpush3.bf16.msra.mxu1 %v1719_v29  ;;  %1729 = vmatpush3.bf16.msra.mxu0 %v1728_v30 }
 0x20c   :  { %1664 = vmatprep.mubr.msk.f32.mxu1 %vm1792_vm5, %v1790_v2  ;;  %1724 = vmatprep.subr.bf16.mxu1 %v1791_v50 }
 0x20d   :  { %1685 = vmatprep.mubr.msk.f32.mxu0 %vm1792_vm5, %v1790_v2  ;;  %1736 = vmatprep.subr.bf16.mxu0 %v1791_v50 }
 0x20e   :  { %1665 = vmatmul.mubr.msk.f32.vlgmr.msra.gmra.mrb[8].mxu1 %vm655_vm6, %v693_v36  ;;  %1686 = vmatmul.mubr.msk.f32.vlgmr.msra.gmra.mrb[8].mxu0 %vm655_vm6, %v711_v37 }
 0x20f   :  { %1726 = vmatpush3.bf16.msra.mxu1 %v1725_v35  ;;  %1678 = vmatprep.mubr.msk.f32.mxu1 %vm1792_vm5, %v1790_v2 }
 0x210   :  { %1730 = vmatprep.subr.bf16.mxu1 %v1791_v50  ;;  %1703 = vmatprep.mubr.msk.f32.mxu0 %vm1792_vm5, %v1790_v2 }
 0x211   :  { %1738 = vmatpush3.bf16.msra.mxu0 %v1737_v17 }
 0x212   :  { %1679 = vmatmul.mubr.msk.f32.vlgmr.msra.gmra.mrb[10].mxu1 %vm655_vm6, %v709_v38 }
 0x213   :  { %1696 = vmatprep.mubr.msk.f32.mxu1 %vm1792_vm5, %v1790_v2  ;;  %1732 = vmatpush3.bf16.msra.mxu1 %v1731_v41  ;;  %v1326_v2 = vld [vmem:[%s2044_s3 + $0x40] sm:$0xff]  ;;  %s1766_s3 = scalar_lea.vmem %s1497_s5, 16 }
 0x214   :  { %1733 = vmatprep.subr.bf16.mxu1 %v1791_v50  ;;  %v1734_v43 = vpack.c.bf16 %v1326_v2, %v1325_v42  ;;  %p1767_p0 = scmp.ne.s32.totalorder %s1497_s5, %s1766_s3  ;;  %p1772_p2 = scmp.lt.s32.totalorder %s1770_s6, %s1766_s3 }
 0x216   :  { %p1773_p3 = por %p1772_p2, %p1771_p1 }
 0x217   :  { %1735 = vmatpush3.bf16.msra.mxu1 %v1734_v43 }
 0x218   :  { %p1774_p4 = pnand %p1773_p3, %p1767_p0 }
 0x2d5   :  { %v796_v44 = vpop.f32.mrb[2].mxu1 }
 0x2d6   :  { %v1638_v45 = vpop.f32.mrb[3].mxu1  ;;  %v1305_v48 = vsel %vm1304_vm7, %v796_v44, 0.0 }
 0x2d9   :  { %v868_v46 = vpop.f32.mrb[4].mxu1  ;;  %v1012_v47 = vpop.f32.mrb[4].mxu0 }
 0x2da   :  { %v1306_v49 = vsel %vm1304_vm7, %v868_v46, 0.0  ;;  %v1645_v50 = vpop.f32.mrb[5].mxu1  ;;  %v1659_v51 = vpop.f32.mrb[5].mxu0  ;;  %v1310_v59 = vsel %vm1304_vm7, %v1012_v47, 0.0 }
 0x2db   :  { %v1307_v52 = vadd.f32 %v1306_v49, %v1305_v48 }
 0x2dd   :  { %v940_v53 = vpop.f32.mrb[6].mxu1  ;;  %v1156_v54 = vpop.f32.mrb[6].mxu0 }
 0x2de   :  { %v1308_v55 = vsel %vm1304_vm7, %v940_v53, 0.0  ;;  %v1652_v56 = vpop.f32.mrb[7].mxu1  ;;  %v1673_v57 = vpop.f32.mrb[7].mxu0  ;;  %v1314_v4 = vsel %vm1304_vm7, %v1156_v54, 0.0 }
 0x2df   :  { %v1309_v58 = vadd.f32 %v1308_v55, %v1307_v52 }
 0x2e1   :  { %v1084_v60 = vpop.f32.mrb[8].mxu1  ;;  %v1311_v61 = vadd.f32 %v1310_v59, %v1309_v58  ;;  %v1300_v62 = vpop.f32.mrb[8].mxu0 }
 0x2e2   :  { %v1312_v63 = vsel %vm1304_vm7, %v1084_v60, 0.0  ;;  %v1666_v0 = vpop.f32.mrb[9].mxu1  ;;  %v1687_v1 = vpop.f32.mrb[9].mxu0  ;;  %v1318_v10 = vsel %vm1304_vm7, %v1300_v62, 0.0 }
 0x2e3   :  { %v1313_v3 = vadd.f32 %v1312_v63, %v1311_v61 }
 0x2e5   :  { %v1228_v5 = vpop.f32.mrb[10].mxu1  ;;  %v1315_v6 = vadd.f32 %v1314_v4, %v1313_v3 }
 0x2e6   :  { %v1316_v7 = vsel %vm1304_vm7, %v1228_v5, 0.0  ;;  %v1680_v8 = vpop.f32.mrb[11].mxu1 }
 0x2e7   :  { %v1317_v9 = vadd.f32 %v1316_v7, %v1315_v6 }
 0x2e9   :  { %v1319_v12 = vadd.f32 %v1318_v10, %v1317_v9 }
 0x2eb   :  { %v1321_v13 = vadd.f32 %v1320_v11, %v1319_v12 }
 0x2ed   :  { %v1322_v14 = vmax.f32 %v1321_v13, 0.0 }
 0x2ef   :  { %1697 = vmatmul.mubr.msk.f32.vlgmr.msra.gmra.mrb[12].mxu1 %vm1328_vm8, %v1322_v14 }
 0x3c2   :  { %v1398_v19 = vpop.f32.mrb[12].mxu1 }
 0x3c3   :  { %v1399_v20 = vadd.f32 %v1398_v19, %v1327_v18  ;;  %v1698_v21 = vpop.f32.mrb[13].mxu1 }
 0x3c5   :  { %v1402_v22 = vmax.f32 %v1399_v20, 0.0 }
 0x3c7   :  { %1704 = vmatmul.mubr.msk.f32.vlgmr.msra.gmra.mrb[10].mxu0 %vm655_vm6, %v1402_v22 }
 0x49a   :  { %v1475_v24 = vpop.f32.mrb[10].mxu0 }
 0x49b   :  { %v1476_v25 = vadd.f32 %v1475_v24, %v1405_v23  ;;  %v1705_v26 = vpop.f32.mrb[11].mxu0 }
 0x49d   :  { %v1479_v27 = vand.u32 2147483647, %v1476_v25  ;;  %vm1483_vm9 = vcmp.ge.f32.partialorder %v1476_v25, 0.0 }
 0x49f   :  { %v1480_v28 = vsub.f32 0.0, %v1479_v27 }
 0x4a1   :  { %v1481_v29 = vmul.f32 1.442695, %v1480_v28 }
 0x4a3   :  { %1762 = vpow2.f32 %v1481_v29 }
 0x4ad   :  { %v1763_v30 = vpop.eup %1762 }
 0x4ae   :  { %v1485_v31 = vadd.f32 1.0, %v1763_v30  ;;  %v1484_v33 = vsel %vm1483_vm9, 1.0, %v1763_v30 }
 0x4b0   :  { %1764 = vrcp.f32 %v1485_v31 }
 0x4ba   :  { %v1765_v32 = vpop.eup %1764 }
 0x4bb   :  { %v1487_v34 = vmul.f32 %v1765_v32, %v1484_v33 }
 0x4bd   :  { %1489 = vst.msk [vmem:[#allocation6] sm:$0x1] %vm1488_vm10, %v1487_v34 }
 0x4be   :  { %1777 = shalt.err (!%p1774_p4)
}
 0x4bf   :  { %s1778_s9 = scalar_lea.hbm %s2045_s4, 16 }
 0x4c0   :  { %p1779_p5 = scmp.ne.s32.totalorder %s2045_s4, %s1778_s9  ;;  %p1782_p6 = scmp.lt.u32.totalorder %s1778_s9, %s2045_s4 }
 0x4c2   :  { %p1784_p7 = pnand %p1782_p6, %p1779_p5 }
 0x4c4   :  { %1787 = shalt.err (!%p1784_p7)
}
 0x4c5   :  { %1499 = dma.vmem_to_hbm [thread:$0]  %s1497_s5, 16, %s2045_s4, [#allocation7]  }
 0x4c6   :  { %1788 = dma.done.wait [#allocation7], 16  }
 0x4c7   :  { %1789 = vsyncadd [#allocation7], 4294967280 }
 0x4c8   :  { %1503 = vsyncpa [#allocation7], 1 }

</bundles_post_ra>
